<compile_context>
chip_gen: v7x
topology: tpu7x:2x2x1
jax: 0.10.0
libtpu: 0.0.40
codegen_flags: <defaults>
</compile_context>

<pallas_src>
import jax
import jax.numpy as jnp
from jax.experimental import pallas as pl
from jax.experimental.pallas import tpu as pltpu

_LANE = 128


def mnl_kernel(beta_ref, x_ref, out_ref):
    # beta_ref: SMEM (V,)       shared coefficients (scalar-prefetched)
    # x_ref:    VMEM (A, V, TB) design matrix, batch on the lane axis
    # out_ref:  VMEM (A, TB)    log-probabilities over alternatives
    A, V, _ = x_ref.shape
    x = x_ref[...].astype(jnp.float32)                 # (A, V, TB), f32 math (v5e-safe)

    # utilities = sum_k X[:, k, :] * beta[k]  -> V unrolled lane-dense FMAs (VPU only)
    u = x[:, 0, :] * beta_ref[0]                       # (A, TB)
    for k in range(1, V):
        u = u + x[:, k, :] * beta_ref[k]

    # numerically stable log_softmax over the (tiny, sublane) alternatives axis
    m = jnp.max(u, axis=0, keepdims=True)              # (1, TB)
    z = u - m
    lse = jnp.log(jnp.sum(jnp.exp(z), axis=0, keepdims=True))
    out_ref[...] = (z - lse).astype(out_ref.dtype)


def mnl_log_softmax(X, beta, *, tb=4096):
    """Pallas implementation of MNLModelShared.forward.

    X:    (B, A, V) float array
    beta: (V,) shared coefficient vector
    returns (B, A) log-probabilities (log_softmax over the alternatives axis).
    """
    B, A, V = X.shape

    # Batch tile: multiple of the 128-lane width; cap at ~ceil(B/2) (rounded up
    # to a lane multiple) so large problems keep >= 2 parallel grid steps
    # (lets v7x shard across both TensorCores).
    tb = max(_LANE, (int(tb) // _LANE) * _LANE)
    half = -(-(-(-B // 2)) // _LANE) * _LANE           # ceil(ceil(B/2)/128)*128
    tb = min(tb, max(_LANE, half))
    B_pad = -(-B // tb) * tb

    # Lane-dense layout: batch last. One-time wrapper transpose + zero pad.
    Xt = jnp.transpose(X, (1, 2, 0))                   # (A, V, B)
    if B_pad != B:
        Xt = jnp.pad(Xt, ((0, 0), (0, 0), (0, B_pad - B)))

    grid = (B_pad // tb,)

    cost = pl.CostEstimate(
        flops=2 * B * A * V,
        transcendentals=2 * B * A,                     # exp + log
        bytes_accessed=B * A * V * 4 + B * A * 4 + V * 4,
    )

    out_t = pl.pallas_call(
        mnl_kernel,
        out_shape=jax.ShapeDtypeStruct((A, B_pad), X.dtype),
        grid_spec=pltpu.PrefetchScalarGridSpec(
            num_scalar_prefetch=1,                     # beta -> SMEM, read as scalars
            grid=grid,
            in_specs=[
                # (V, TB) trailing dims: V at full extent, TB a multiple of 128.
                pl.BlockSpec((A, V, tb), lambda i, beta_sm: (0, 0, i)),
            ],
            out_specs=pl.BlockSpec((A, tb), lambda i, beta_sm: (0, i)),
        ),
        compiler_params=pltpu.CompilerParams(
            dimension_semantics=("parallel",),
            # Lane-dense tiles are tiny (~O(100 KiB) double-buffered); 32 MiB is
            # explicit, ample, and safe on v5e/v6e/v7x alike.
            vmem_limit_bytes=32 * 1024 * 1024,
        ),
        cost_estimate=cost,
    )(beta.astype(jnp.float32), Xt)

    # Back to the PyTorch (B, A) layout; drop batch padding.
    return jnp.transpose(out_t, (1, 0))[:B]


if __name__ == "__main__":
    # Small shapes consistent with the module: num_sessions x no_alts x n_vars
    num_sessions, no_alts, n_vars = 16, 3, 4

    key = jax.random.PRNGKey(0)
    kx, kb = jax.random.split(key)
    X = jax.random.normal(kx, (num_sessions, no_alts, n_vars), dtype=jnp.float32)

    # Module __init__ uses torch.zeros(n_vars); use small random values so the
    # kernel math is exercised non-trivially.
    beta = 0.1 * jax.random.normal(kb, (n_vars,), dtype=jnp.float32)

    out = jax.block_until_ready(mnl_log_softmax(X, beta))

    # Pure-JAX reference for validation.
    ref = jax.nn.log_softmax(jnp.einsum("bav,v->ba", X, beta), axis=1)

    assert out.shape == (num_sessions, no_alts)
    assert jnp.allclose(out, ref, atol=1e-5, rtol=1e-5), "mismatch vs reference"

    print("KERNEL_OK")
</pallas_src>

<mosaic_0001>
module attributes {stable_mosaic.version = 11 : i64} {
  func.func @mnl_kernel(%arg0: i32, %arg1: memref<4xf32, #tpu.memory_space<smem>>, %arg2: memref<3x4x128xf32, #tpu.memory_space<vmem>>, %arg3: memref<3x128xf32, #tpu.memory_space<vmem>>) attributes {dimension_semantics = [#tpu.dimension_semantics<parallel>], iteration_bounds = array<i64: 1>, scalar_prefetch = 1 : i64, scratch_operands = 0 : i64, tpu.core_type = #tpu.core_type<tc>, window_params = [{transform_indices = @transform_0, window_bounds = array<i64: 3, 4, 128>}, {transform_indices = @transform_1, window_bounds = array<i64: 3, 128>}]} {
    %c0 = arith.constant 0 : index
    %c0_0 = arith.constant 0 : index
    %c0_1 = arith.constant 0 : index
    %0 = vector.load %arg2[%c0, %c0_0, %c0_1] : memref<3x4x128xf32, #tpu.memory_space<vmem>>, vector<3x4x128xf32>
    %1 = vector.extract_strided_slice %0 {offsets = [0, 0, 0], sizes = [3, 1, 128], strides = [1, 1, 1]} : vector<3x4x128xf32> to vector<3x1x128xf32>
    %2 = vector.shape_cast %1 : vector<3x1x128xf32> to vector<3x128xf32>
    %c0_2 = arith.constant 0 : index
    %3 = memref.load %arg1[%c0_2] : memref<4xf32, #tpu.memory_space<smem>>
    %4 = vector.broadcast %3 : f32 to vector<3x128xf32>
    %5 = arith.mulf %2, %4 : vector<3x128xf32>
    %6 = vector.extract_strided_slice %0 {offsets = [0, 1, 0], sizes = [3, 1, 128], strides = [1, 1, 1]} : vector<3x4x128xf32> to vector<3x1x128xf32>
    %7 = vector.shape_cast %6 : vector<3x1x128xf32> to vector<3x128xf32>
    %c1 = arith.constant 1 : index
    %8 = memref.load %arg1[%c1] : memref<4xf32, #tpu.memory_space<smem>>
    %9 = vector.broadcast %8 : f32 to vector<3x128xf32>
    %10 = arith.mulf %7, %9 : vector<3x128xf32>
    %11 = arith.addf %5, %10 : vector<3x128xf32>
    %12 = vector.extract_strided_slice %0 {offsets = [0, 2, 0], sizes = [3, 1, 128], strides = [1, 1, 1]} : vector<3x4x128xf32> to vector<3x1x128xf32>
    %13 = vector.shape_cast %12 : vector<3x1x128xf32> to vector<3x128xf32>
    %c2 = arith.constant 2 : index
    %14 = memref.load %arg1[%c2] : memref<4xf32, #tpu.memory_space<smem>>
    %15 = vector.broadcast %14 : f32 to vector<3x128xf32>
    %16 = arith.mulf %13, %15 : vector<3x128xf32>
    %17 = arith.addf %11, %16 : vector<3x128xf32>
    %18 = vector.extract_strided_slice %0 {offsets = [0, 3, 0], sizes = [3, 1, 128], strides = [1, 1, 1]} : vector<3x4x128xf32> to vector<3x1x128xf32>
    %19 = vector.shape_cast %18 : vector<3x1x128xf32> to vector<3x128xf32>
    %c3 = arith.constant 3 : index
    %20 = memref.load %arg1[%c3] : memref<4xf32, #tpu.memory_space<smem>>
    %21 = vector.broadcast %20 : f32 to vector<3x128xf32>
    %22 = arith.mulf %19, %21 : vector<3x128xf32>
    %23 = arith.addf %17, %22 : vector<3x128xf32>
    %cst = arith.constant dense<0xFF800000> : vector<128xf32>
    %24 = vector.multi_reduction <maximumf>, %23, %cst [0] : vector<3x128xf32> to vector<128xf32>
    %25 = vector.shape_cast %24 : vector<128xf32> to vector<1x128xf32>
    %26 = vector.broadcast %25 : vector<1x128xf32> to vector<3x128xf32>
    %27 = arith.subf %23, %26 : vector<3x128xf32>
    %28 = math.exp %27 : vector<3x128xf32>
    %cst_3 = arith.constant dense<0.000000e+00> : vector<128xf32>
    %29 = vector.multi_reduction <add>, %28, %cst_3 [0] : vector<3x128xf32> to vector<128xf32>
    %30 = vector.shape_cast %29 : vector<128xf32> to vector<1x128xf32>
    %31 = math.log %30 : vector<1x128xf32>
    %32 = vector.broadcast %31 : vector<1x128xf32> to vector<3x128xf32>
    %33 = arith.subf %27, %32 : vector<3x128xf32>
    %c0_4 = arith.constant 0 : index
    %c0_5 = arith.constant 0 : index
    %34 = vector.load %arg3[%c0_4, %c0_5] : memref<3x128xf32, #tpu.memory_space<vmem>>, vector<3x128xf32>
    tpu.vector_store %arg3[%c0_4, %c0_5], %33 {strides = array<i32>} : memref<3x128xf32, #tpu.memory_space<vmem>>, vector<3x128xf32>,
    return
  }
  func.func @transform_0(%arg0: i32, %arg1: memref<4xf32, #tpu.memory_space<smem>>) -> (i32, i32, i32) {
    %c0_i32 = arith.constant 0 : i32
    %c0_i32_0 = arith.constant 0 : i32
    %c0_i32_1 = arith.constant 0 : i32
    return %c0_i32, %c0_i32_0, %arg0 : i32, i32, i32
  }
  func.func @transform_1(%arg0: i32, %arg1: memref<4xf32, #tpu.memory_space<smem>>) -> (i32, i32) {
    %c0_i32 = arith.constant 0 : i32
    %c0_i32_0 = arith.constant 0 : i32
    return %c0_i32, %arg0 : i32, i32
  }
}

</mosaic_0001>

<bundles_post_ra>
// kernel: tpu_custom_call.1
= control target key start
LH: loop header
LB: loop body
LE: loop exit
PB: predicated region body
PF: predicated region fallthrough
CT: control target
= control target key end

     0   :  { %s293_s0 = inlined_call_operand.hbm [shape: f32[4], index: 0, kind: input, shape index: {}]   ;;  %s294_s1 = inlined_call_operand.hbm [shape: f32[3,4,128], index: 1, kind: input, shape index: {}]   ;;  %s295_s2 = inlined_call_operand.hbm [shape: f32[3,128], index: 2, kind: output, shape index: {}]  }
   0x1   :  { %s173_s11 = scalar_lea.hbm %s293_s0, 16 }
   0x2   :  { %p174_p0 = scmp.ne.s32.totalorder %s293_s0, %s173_s11  ;;  %p177_p1 = scmp.lt.u32.totalorder %s173_s11, %s293_s0 }
   0x4   :  { %p179_p2 = pnand %p177_p1, %p174_p0 }
   0x6   :  { %182 = shalt.err (!%p179_p2)  }
   0x7   :  { %s233_s16 = smov [#allocation3]  }
   0x8   :  { %8 = dma.hbm_to_smem %s293_s0, 16, %s233_s16, [#allocation2] }
   0x9   :  { %227 = dma.done.wait [#allocation2], 16 }
   0xa   :  { %228 = vsyncadd [#allocation2], 4294967280 }
   0xb   :  { %10 = sfence }
   0xc   :  { %11 = vsyncpa [#allocation5], 0 }
   0xd   :  { %12 = vsyncpa [#allocation6], 0  ;;  %s234_s19 = smov [#allocation4]   ;;  %s183_s23 = scalar_lea.hbm %s294_s1, 192 }
   0xe   :  { %s18_s20 = sshll.u32 %s234_s19, 4  ;;  %p184_p3 = scmp.ne.s32.totalorder %s294_s1, %s183_s23  ;;  %s19_s20 = int_to_ptr.vmem [resolvable:$true] %s18_s20 }
   0xf   :  { %p187_p4 = scmp.lt.u32.totalorder %s183_s23, %s294_s1 }
  0x11   :  { %p189_p5 = pnand %p187_p4, %p184_p3 }
  0x13   :  { %192 = shalt.err (!%p189_p5)
}
  0x14   :  { %s193_s0 = scalar_lea.vmem %s19_s20, 192  ;;  %p198_p7 = scmp.lt.s32.totalorder %s19_s20, %s19_s20 }
  0x15   :  { %p194_p6 = scmp.ne.s32.totalorder %s19_s20, %s193_s0  ;;  %p199_p8 = scmp.lt.s32.totalorder %s193_s0, %s193_s0 }
  0x17   :  { %p200_p9 = por %p199_p8, %p198_p7 }
  0x19   :  { %p201_p10 = pnand %p200_p9, %p194_p6 }
  0x1b   :  { %204 = shalt.err (!%p201_p10)
}
  0x1c   :  { %s235_s28 = smov 64   ;;  %s236_s29 = smov 4  }
  0x1d   :  { %24 = dma.hbm_to_vmem [thread:$0]  %s294_s1, 192, %s19_s20, [#allocation5], %s235_s28, %s235_s28, %s236_s29  }
  0x1e   :  { %229 = dma.done.wait [#allocation5], 192  }
  0x1f   :  { %230 = vsyncadd [#allocation5], 4294967104  ;;  %s31_s4 = sld [smem:[#allocation3]]  ;;  %s157_s5 = sld [smem:[#allocation3 + $0x1]]  ;;  %v28_v0 = vld [vmem:[#allocation4] sm:$0xf]  ;;  %v93_v5 = vlaneseq }
  0x20   :  { %s158_s6 = sld [smem:[#allocation3 + $0x2]]  ;;  %s159_s7 = sld [smem:[#allocation3 + $0x3]]  ;;  %v29_v1 = vld [vmem:[#allocation4 + $0x4] sm:$0xf]  ;;  %v30_v2 = vld [vmem:[#allocation4 + $0x8] sm:$0xf] }
  0x21   :  { %vm87_vm0 = vcmask 1040384   ;;  %v94_v36 = vshrl.u32 %v93_v5, 7  ;;  %vm110_vm1 = vcmask 1041409   ;;  %vm113_vm2 = vcmask 1042434   ;;  %s237_s1 = smov [#allocation7]  }
  0x22   :  { %vm116_vm3 = vcmask 1042432   ;;  %s148_s8 = sshll.u32 %s237_s1, 4  ;;  %s149_s8 = int_to_ptr.vmem [resolvable:$true] %s148_s8 }
  0x23   :  { %v95_v43 = vsub.s32 0, %v94_v36  ;;  %s205_s9 = scalar_lea.vmem %s149_s8, 64  ;;  %p210_p12 = scmp.lt.s32.totalorder %s149_s8, %s149_s8 }
  0x24   :  { %p206_p11 = scmp.ne.s32.totalorder %s149_s8, %s205_s9  ;;  %p211_p13 = scmp.lt.s32.totalorder %s205_s9, %s205_s9 }
  0x25   :  { %v32_v3 = vstv %s31_s4  ;;  %v37_v4 = vstv %s157_s5 }
  0x26   :  { %v33_v6 = vmul.f32 %v32_v3, %v28_v0  ;;  %v34_v7 = vmul.f32 %v32_v3, %v29_v1  ;;  %v35_v8 = vmul.f32 %v32_v3, %v30_v2  ;;  %v38_v9 = vmul.f32 %v37_v4, %v28_v0  ;;  %p212_p0 = por %p211_p13, %p210_p12 }
  0x27   :  { %v39_v10 = vmul.f32 %v37_v4, %v29_v1  ;;  %v40_v11 = vmul.f32 %v37_v4, %v30_v2  ;;  %v54_v12 = vstv %s158_s6  ;;  %v71_v13 = vstv %s159_s7 }
  0x28   :  { %v44_v14 = vrot.slane %v38_v9, 1  ;;  %v55_v15 = vmul.f32 %v54_v12, %v28_v0  ;;  %v56_v16 = vmul.f32 %v54_v12, %v29_v1  ;;  %v57_v17 = vmul.f32 %v54_v12, %v30_v2  ;;  %p213_p1 = pnand %p212_p0, %p206_p11 }
  0x29   :  { %v45_v18 = vrot.slane %v39_v10, 1  ;;  %v46_v19 = vrot.slane %v40_v11, 1  ;;  %v72_v20 = vmul.f32 %v71_v13, %v28_v0  ;;  %v73_v21 = vmul.f32 %v71_v13, %v29_v1 }
  0x2a   :  { %v50_v22 = vadd.f32 %v44_v14, %v33_v6  ;;  %v61_v23 = vrot.slane %v55_v15, 2  ;;  %v62_v24 = vrot.slane %v56_v16, 2  ;;  %v63_v25 = vrot.slane %v57_v17, 2 }
  0x2b   :  { %v51_v26 = vadd.f32 %v45_v18, %v34_v7  ;;  %v52_v27 = vadd.f32 %v46_v19, %v35_v8  ;;  %v74_v28 = vmul.f32 %v71_v13, %v30_v2  ;;  %v78_v29 = vrot.slane %v72_v20, 3 }
  0x2c   :  { %v67_v30 = vadd.f32 %v61_v23, %v50_v22  ;;  %v79_v31 = vrot.slane %v73_v21, 3 }
  0x2d   :  { %v68_v32 = vadd.f32 %v62_v24, %v51_v26  ;;  %v69_v33 = vadd.f32 %v63_v25, %v52_v27  ;;  %v80_v34 = vrot.slane %v74_v28, 3 }
  0x2e   :  { %v84_v35 = vadd.f32 %v78_v29, %v67_v30 }
  0x2f   :  { %v85_v37 = vadd.f32 %v79_v31, %v68_v32  ;;  %v86_v38 = vadd.f32 %v80_v34, %v69_v33 }
  0x30   :  { %v88_v39 = vsel %vm87_vm0, %v84_v35, -inf }
  0x31   :  { %v89_v40 = vsel %vm87_vm0, %v85_v37, -inf  ;;  %v90_v41 = vsel %vm87_vm0, %v86_v38, -inf }
  0x32   :  { %v91_v42 = vmax.f32 %v88_v39, %v89_v40 }
  0x34   :  { %v92_v44 = vmax.f32 %v91_v42, %v90_v41 }
  0x36   :  { %v96_v45 = vrot.slane %v92_v44, %v95_v43 }
  0x38   :  { %v97_v46 = vsub.f32 %v84_v35, %v96_v45  ;;  %v98_v47 = vsub.f32 %v85_v37, %v96_v45  ;;  %v99_v48 = vsub.f32 %v86_v38, %v96_v45 }
  0x3a   :  { %v100_v49 = vmul.f32 1.442695, %v97_v46  ;;  %v102_v50 = vmul.f32 1.442695, %v98_v47  ;;  %v104_v51 = vmul.f32 1.442695, %v99_v48 }
  0x3c   :  { %165 = vpow2.f32 %v100_v49 }
  0x3d   :  { %167 = vpow2.f32 %v102_v50 }
  0x3e   :  { %169 = vpow2.f32 %v104_v51 }
  0x46   :  { %v166_v52 = vpop.eup %165 }
  0x47   :  { %v168_v53 = vpop.eup %167 }
  0x48   :  { %v170_v54 = vpop.eup %169  ;;  %v109_v55 = vrot.slane %v168_v53, 7 }
  0x49   :  { %v112_v56 = vrot.slane %v170_v54, 6 }
  0x4a   :  { %v111_v57 = vsel %vm110_vm1, %v109_v55, %v166_v52 }
  0x4b   :  { %v114_v58 = vsel %vm113_vm2, %v112_v56, %v111_v57 }
  0x4c   :  { %v117_v59 = vsel %vm116_vm3, %v114_v58, 0.0 }
  0x4d   :  { %v118_v60 = vrot.slane %v117_v59, 4 }
  0x4f   :  { %v119_v61 = vadd.f32 %v118_v60, %v117_v59 }
  0x51   :  { %v120_v62 = vrot.slane %v119_v61, 2 }
  0x53   :  { %v121_v63 = vadd.f32 %v120_v62, %v119_v61 }
  0x55   :  { %v122_v0 = vrot.slane %v121_v63, 1 }
  0x57   :  { %v123_v1 = vadd.f32 %v122_v0, %v121_v63 }
  0x59   :  { %171 = vlog2.f32 %v123_v1 }
  0x63   :  { %v172_v2 = vpop.eup %171 }
  0x64   :  { %v125_v3 = vmul.f32 0.6931472, %v172_v2 }
  0x66   :  { %v129_v4 = vrot.slane %v125_v3, %v95_v43 }
  0x68   :  { %v130_v5 = vsub.f32 %v97_v46, %v129_v4  ;;  %v131_v6 = vsub.f32 %v98_v47, %v129_v4  ;;  %v132_v7 = vsub.f32 %v99_v48, %v129_v4 }
  0x6a   :  { %v136_v8 = vrot.slane %v131_v6, 7  ;;  %v138_v9 = vrot.slane %v132_v7, 6 }
  0x6c   :  { %v137_v10 = vsel %vm110_vm1, %v136_v8, %v130_v5 }
  0x6d   :  { %v139_v11 = vsel %vm113_vm2, %v138_v9, %v137_v10 }
  0x6e   :  { %141 = vst [vmem:[#allocation7] sm:$0x7] %v139_v11 }
  0x6f   :  { %216 = shalt.err (!%p213_p1)
}
  0x70   :  { %s217_s12 = scalar_lea.hbm %s295_s2, 64 }
  0x71   :  { %p218_p2 = scmp.ne.s32.totalorder %s295_s2, %s217_s12  ;;  %p221_p3 = scmp.lt.u32.totalorder %s217_s12, %s295_s2 }
  0x73   :  { %p223_p4 = pnand %p221_p3, %p218_p2 }
  0x75   :  { %226 = shalt.err (!%p223_p4)
}
  0x76   :  { %151 = dma.vmem_to_hbm [thread:$0]  %s149_s8, 64, %s295_s2, [#allocation6]  }
  0x77   :  { %231 = dma.done.wait [#allocation6], 64  }
  0x78   :  { %232 = vsyncadd [#allocation6], 4294967232 }
  0x79   :  { %155 = vsyncpa [#allocation5], 1 }
  0x7a   :  { %156 = vsyncpa [#allocation6], 1 }

</bundles_post_ra>
